<compile_context>
chip_gen: v7x
topology: tpu7x:2x2x1
jax: 0.10.0
libtpu: 0.0.40
codegen_flags: <defaults>
</compile_context>

<pallas_src>
import jax
import jax.numpy as jnp
from jax import lax
from jax.experimental import pallas as pl
from jax.experimental.pallas import tpu as pltpu


def _round_up(n, m):
    return ((n + m - 1) // m) * m


def _cos_classifier_kernel(x_ref, w_ref, wn_ref, o_ref):
    """Computes one (tile_B, tile_C) tile of the cosine-distance matrix.

    x_ref : (tile_B, D) f32   raw features
    w_ref : (tile_C, D) f32   pre-normalized classifier rows (the parameter)
    wn_ref: (1, tile_C) f32   precomputed ||w_j|| (hoisted out of the kernel)
    o_ref : (tile_B, tile_C) f32
    """
    x = x_ref[...].astype(jnp.float32)
    w = w_ref[...].astype(jnp.float32)
    w_norm = wn_ref[...]                                    # (1, tile_C)

    # F.normalize(x, p=2, dim=-1, eps=1e-12): x / max(||x||, 1e-12)
    sq = jnp.sum(x * x, axis=-1, keepdims=True)             # (tile_B, 1)
    x_norm = jnp.sqrt(sq)                                   # ||x||
    inv = lax.rsqrt(jnp.maximum(sq, 1e-24))                 # == 1 / max(||x||, 1e-12)
    x_hat = x * inv                                         # (tile_B, D)
    # ||x_hat|| without another (B, D) reduction: ||x|| / max(||x||, 1e-12)
    xh_norm = x_norm * inv                                  # (tile_B, 1), ~= 1

    # (tile_B, D) . (tile_C, D) contracted on the last dim of both -> (tile_B, tile_C).
    # No explicit transpose of w (maps directly to the MXU's native layout).
    dots = lax.dot_general(
        x_hat, w,
        dimension_numbers=(((1,), (1,)), ((), ())),
        preferred_element_type=jnp.float32)

    # CosineSimilarity(eps=1e-4) denominator: max(||a|| * ||b||, 1e-4)
    denom = jnp.maximum(xh_norm * w_norm, 1e-4)             # (tile_B, tile_C)
    o_ref[...] = dots * pl.reciprocal(denom, approx=True)


def cos_classifier_forward(x, classifier, classifier_norm=None, *, tile_b=256, tile_c=512):
    """x: (B, D) features, classifier: (C, D) pre-normalized parameter,
    classifier_norm: optional (C,) precomputed row norms.  Returns (B, C) f32."""
    B, D = x.shape
    C, Dw = classifier.shape
    assert D == Dw

    x = x.astype(jnp.float32)
    classifier = classifier.astype(jnp.float32)
    if classifier_norm is None:
        classifier_norm = jnp.sqrt(jnp.sum(classifier * classifier, axis=-1))
    classifier_norm = classifier_norm.astype(jnp.float32)

    # Tile sizes: B tiles sublane-aligned (mult of 8), C tiles lane-dense (mult of 128).
    tb = min(tile_b, _round_up(B, 8))
    tc = min(tile_c, _round_up(C, 128))
    Bp = _round_up(B, tb)
    Cp = _round_up(C, tc)

    # Zero padding is safe: padded rows have zero norm -> zero output, sliced off below.
    x_p = jnp.pad(x, ((0, Bp - B), (0, 0)))
    w_p = jnp.pad(classifier, ((0, Cp - C), (0, 0)))
    wn_p = jnp.pad(classifier_norm, (0, Cp - C)).reshape(1, Cp)

    grid = (Bp // tb, Cp // tc)

    out = pl.pallas_call(
        _cos_classifier_kernel,
        out_shape=jax.ShapeDtypeStruct((Bp, Cp), jnp.float32),
        grid_spec=pltpu.PrefetchScalarGridSpec(
            num_scalar_prefetch=0,
            grid=grid,
            in_specs=[
                pl.BlockSpec((tb, D), lambda i, j: (i, 0)),   # x tile resident across j
                pl.BlockSpec((tc, D), lambda i, j: (j, 0)),   # classifier tile
                pl.BlockSpec((1, tc), lambda i, j: (0, j)),   # hoisted ||w|| row
            ],
            out_specs=pl.BlockSpec((tb, tc), lambda i, j: (i, j)),
        ),
        compiler_params=pltpu.CompilerParams(
            dimension_semantics=("parallel", "parallel"),
        ),
    )(x_p, w_p, wn_p)

    return out[:B, :C]


def make_classifier_param(embavg):
    """__init__: parameter = F.normalize(embavg, p=2, dim=-1, eps=1e-12).
    Also returns the parameter's row norms, hoisted out of the forward kernel."""
    embavg = embavg.astype(jnp.float32)
    n = jnp.sqrt(jnp.sum(embavg * embavg, axis=-1, keepdims=True))
    w = embavg / jnp.maximum(n, 1e-12)
    w_norm = jnp.sqrt(jnp.sum(w * w, axis=-1))               # (C,), ~= 1
    return w, w_norm


def _reference(x, classifier):
    """Pure-JAX reference of the PyTorch forward."""
    xn = jnp.sqrt(jnp.sum(x * x, axis=-1, keepdims=True))
    x_hat = x / jnp.maximum(xn, 1e-12)
    xh_n = jnp.sqrt(jnp.sum(x_hat * x_hat, axis=-1))             # (B,)
    w_n = jnp.sqrt(jnp.sum(classifier * classifier, axis=-1))    # (C,)
    dots = x_hat @ classifier.T
    denom = jnp.maximum(xh_n[:, None] * w_n[None, :], 1e-4)
    return dots / denom


if __name__ == "__main__":
    key = jax.random.PRNGKey(0)
    k1, k2 = jax.random.split(key)

    B, C, D = 8, 16, 32  # batch, num classes (experiment x sirna prototypes), embedding dim

    x = jax.random.normal(k1, (B, D), dtype=jnp.float32)
    embavg = jax.random.normal(k2, (C, D), dtype=jnp.float32)  # synthetic "embavg"

    classifier, classifier_norm = make_classifier_param(embavg)  # parameter setup (plain JAX glue)

    out = cos_classifier_forward(x, classifier, classifier_norm)
    out = jax.block_until_ready(out)

    ref = _reference(x, classifier)
    assert out.shape == (B, C)
    err = float(jnp.max(jnp.abs(out - ref)))
    # approx-reciprocal on denom ~= 1 adds < ~2.5e-4 abs error on values in [-1, 1]
    assert err < 1e-3, f"max abs err {err}"

    print("KERNEL_OK")
</pallas_src>

<mosaic_0001>
module attributes {stable_mosaic.version = 11 : i64} {
  func.func @_cos_classifier_kernel(%arg0: i32, %arg1: i32, %arg2: memref<8x32xf32, #tpu.memory_space<vmem>>, %arg3: memref<128x32xf32, #tpu.memory_space<vmem>>, %arg4: memref<1x128xf32, #tpu.memory_space<vmem>>, %arg5: memref<8x128xf32, #tpu.memory_space<vmem>>) attributes {dimension_semantics = [#tpu.dimension_semantics<parallel>, #tpu.dimension_semantics<parallel>], iteration_bounds = array<i64: 1, 1>, scalar_prefetch = 0 : i64, scratch_operands = 0 : i64, tpu.core_type = #tpu.core_type<tc>, window_params = [{transform_indices = @transform_0, window_bounds = array<i64: 8, 32>}, {transform_indices = @transform_1, window_bounds = array<i64: 128, 32>}, {transform_indices = @transform_2, window_bounds = array<i64: 1, 128>}, {transform_indices = @transform_3, window_bounds = array<i64: 8, 128>}]} {
    %c0 = arith.constant 0 : index
    %c0_0 = arith.constant 0 : index
    %0 = vector.load %arg2[%c0, %c0_0] : memref<8x32xf32, #tpu.memory_space<vmem>>, vector<8x32xf32>
    %c0_1 = arith.constant 0 : index
    %c0_2 = arith.constant 0 : index
    %1 = vector.load %arg3[%c0_1, %c0_2] : memref<128x32xf32, #tpu.memory_space<vmem>>, vector<128x32xf32>
    %c0_3 = arith.constant 0 : index
    %c0_4 = arith.constant 0 : index
    %2 = vector.load %arg4[%c0_3, %c0_4] : memref<1x128xf32, #tpu.memory_space<vmem>>, vector<1x128xf32>
    %3 = arith.mulf %0, %0 : vector<8x32xf32>
    %cst = arith.constant dense<0.000000e+00> : vector<8xf32>
    %4 = vector.multi_reduction <add>, %3, %cst [1] : vector<8x32xf32> to vector<8xf32>
    %5 = vector.shape_cast %4 : vector<8xf32> to vector<8x1xf32>
    %6 = math.sqrt %5 : vector<8x1xf32>
    %cst_5 = arith.constant 1.000000e-24 : f32
    %7 = vector.broadcast %cst_5 : f32 to vector<8x1xf32>
    %8 = arith.maximumf %5, %7 : vector<8x1xf32>
    %9 = math.rsqrt %8 : vector<8x1xf32>
    %10 = vector.broadcast %9 : vector<8x1xf32> to vector<8x32xf32>
    %11 = arith.mulf %0, %10 : vector<8x32xf32>
    %12 = arith.mulf %6, %9 : vector<8x1xf32>
    %cst_6 = arith.constant dense<0.000000e+00> : vector<8x128xf32>
    %13 = tpu.matmul %11, %1, %cst_6 {dimension_numbers = #tpu.dot_dimension_numbers<[1], [1], [0], [0], [0, 0, 1, 0], [], []>} : vector<8x32xf32>, vector<128x32xf32>, vector<8x128xf32> -> vector<8x128xf32>
    %14 = vector.broadcast %12 : vector<8x1xf32> to vector<8x128xf32>
    %15 = vector.broadcast %2 : vector<1x128xf32> to vector<8x128xf32>
    %16 = arith.mulf %14, %15 : vector<8x128xf32>
    %cst_7 = arith.constant 9.99999974E-5 : f32
    %17 = vector.broadcast %cst_7 : f32 to vector<8x128xf32>
    %18 = arith.maximumf %16, %17 : vector<8x128xf32>
    %19 = tpu.reciprocal %18 {approx = true} : vector<8x128xf32> -> vector<8x128xf32>
    %20 = arith.mulf %13, %19 : vector<8x128xf32>
    %c0_8 = arith.constant 0 : index
    %c0_9 = arith.constant 0 : index
    %21 = vector.load %arg5[%c0_8, %c0_9] : memref<8x128xf32, #tpu.memory_space<vmem>>, vector<8x128xf32>
    tpu.vector_store %arg5[%c0_8, %c0_9], %20 {strides = array<i32>} : memref<8x128xf32, #tpu.memory_space<vmem>>, vector<8x128xf32>,
    return
  }
  func.func @transform_0(%arg0: i32, %arg1: i32) -> (i32, i32) {
    %c0_i32 = arith.constant 0 : i32
    %c0_i32_0 = arith.constant 0 : i32
    return %arg0, %c0_i32 : i32, i32
  }
  func.func @transform_1(%arg0: i32, %arg1: i32) -> (i32, i32) {
    %c0_i32 = arith.constant 0 : i32
    %c0_i32_0 = arith.constant 0 : i32
    return %arg1, %c0_i32 : i32, i32
  }
  func.func @transform_2(%arg0: i32, %arg1: i32) -> (i32, i32) {
    %c0_i32 = arith.constant 0 : i32
    %c0_i32_0 = arith.constant 0 : i32
    return %c0_i32, %arg1 : i32, i32
  }
  func.func @transform_3(%arg0: i32, %arg1: i32) -> (i32, i32) {
    %c0_i32 = arith.constant 0 : i32
    return %arg0, %arg1 : i32, i32
  }
}

</mosaic_0001>

<bundles_post_ra>
// kernel: tpu_custom_call.1
= control target key start
LH: loop header
LB: loop body
LE: loop exit
PB: predicated region body
PF: predicated region fallthrough
CT: control target
= control target key end

     0   :  { %vm34_vm0 = vcmask 261120   ;;  %v331_v5 = vmov 0.0|0.0   ;;  %s450_s0 = inlined_call_operand.vmem [shape: f32[8,32], index: 0, kind: input, shape index: {}]   ;;  %s451_s1 = inlined_call_operand.vmem [shape: f32[128,32], index: 1, kind: input, shape index: {}]   ;;  %s452_s2 = inlined_call_operand.vmem [shape: f32[1,128], index: 2, kind: input, shape index: {}]   ;;  %s453_s3 = inlined_call_operand.hbm [shape: f32[8,128], index: 3, kind: output, shape index: {}]  }
   0x1   :  { %v358_v0 = vld [vmem:[%s450_s0] sm:$0xff]  ;;  %v17_v2 = vld [vmem:[%s451_s1 + $0x8] sm:$0xff]  ;;  %vm370_vm1 = vmpackc.low %vm34_vm0, %vm34_vm0  ;;  %265 = vmatprep.subr.bf16.mxu0 %v331_v5 }
   0x2   :  { %v16_v1 = vld [vmem:[%s451_s1] sm:$0xff]  ;;  %v33_v3 = vmul.f32 %v358_v0, %v358_v0  ;;  %v18_v8 = vld [vmem:[%s451_s1 + $0x10] sm:$0xff]  ;;  %v19_v9 = vld [vmem:[%s451_s1 + $0x18] sm:$0xff] }
   0x3   :  { %v266_v6 = vpack.c.bf16 %v17_v2, %v16_v1 }
   0x4   :  { %v35_v7 = vsel %vm34_vm0, %v33_v3, 0.0 }
   0x5   :  { %268 = vmatpush3.bf16.xpose.msk.msra.mxu0 %vm370_vm1, %v266_v6  ;;  %36 = vadd.xlane.f32.xlu0 %v35_v7 }
   0x6   :  { %269 = vmatprep.subr.bf16.mxu0 %v331_v5 }
   0x7   :  { %8 = vsyncpa [#allocation3], 0  ;;  %v270_v10 = vpack.c.bf16 %v19_v9, %v18_v8  ;;  %v20_v11 = vld [vmem:[%s451_s1 + $0x20] sm:$0xff]  ;;  %v21_v12 = vld [vmem:[%s451_s1 + $0x28] sm:$0xff]  ;;  %vm332_vm2 = vmmov 0   ;;  %v333_v20 = vmov 0.0  }
   0x8   :  { %v274_v13 = vpack.c.bf16 %v21_v12, %v20_v11  ;;  %v22_v14 = vld [vmem:[%s451_s1 + $0x30] sm:$0xff]  ;;  %v23_v15 = vld [vmem:[%s451_s1 + $0x38] sm:$0xff]  ;;  %v24_v17 = vld [vmem:[%s451_s1 + $0x40] sm:$0xff]  ;;  %262 = vmatprep.mubr.msk.f32.mxu0 %vm332_vm2, %v333_v20  ;;  %s334_s18 = smov [#allocation2]  }
   0x9   :  { %v278_v16 = vpack.c.bf16 %v23_v15, %v22_v14  ;;  %v25_v18 = vld [vmem:[%s451_s1 + $0x48] sm:$0xff]  ;;  %v26_v21 = vld [vmem:[%s451_s1 + $0x50] sm:$0xff]  ;;  %v27_v22 = vld [vmem:[%s451_s1 + $0x58] sm:$0xff]  ;;  %s187_s19 = sshll.u32 %s334_s18, 4  ;;  %s188_s19 = int_to_ptr.vmem [resolvable:$true] %s187_s19 }
   0xa   :  { %v282_v19 = vpack.c.bf16 %v25_v18, %v24_v17  ;;  %v286_v23 = vpack.c.bf16 %v27_v22, %v26_v21  ;;  %v28_v24 = vld [vmem:[%s451_s1 + $0x60] sm:$0xff]  ;;  %v29_v25 = vld [vmem:[%s451_s1 + $0x68] sm:$0xff]  ;;  %v30_v27 = vld [vmem:[%s451_s1 + $0x70] sm:$0xff]  ;;  %s307_s20 = scalar_lea.vmem %s188_s19, 128  ;;  %p312_p1 = scmp.lt.s32.totalorder %s188_s19, %s188_s19 }
   0xb   :  { %v290_v26 = vpack.c.bf16 %v29_v25, %v28_v24  ;;  %v31_v28 = vld [vmem:[%s451_s1 + $0x78] sm:$0xff]  ;;  %v212_v40 = vld [vmem:[%s452_s2] ss:$0 sm:$0xff]  ;;  %p308_p0 = scmp.ne.s32.totalorder %s188_s19, %s307_s20  ;;  %p313_p2 = scmp.lt.s32.totalorder %s307_s20, %s307_s20 }
   0xc   :  { %v294_v29 = vpack.c.bf16 %v31_v28, %v30_v27 }
   0xd   :  { %272 = vmatpush3.bf16.xpose.msk.msra.mxu0 %vm370_vm1, %v270_v10  ;;  %p314_p3 = por %p313_p2, %p312_p1 }
   0xe   :  { %273 = vmatprep.subr.bf16.mxu0 %v331_v5 }
   0xf   :  { %p315_p4 = pnand %p314_p3, %p308_p0 }
  0x15   :  { %276 = vmatpush3.bf16.xpose.msk.msra.mxu0 %vm370_vm1, %v274_v13 }
  0x16   :  { %277 = vmatprep.subr.bf16.mxu0 %v331_v5 }
  0x1d   :  { %280 = vmatpush3.bf16.xpose.msk.msra.mxu0 %vm370_vm1, %v278_v16 }
  0x1e   :  { %281 = vmatprep.subr.bf16.mxu0 %v331_v5 }
  0x25   :  { %284 = vmatpush3.bf16.xpose.msk.msra.mxu0 %vm370_vm1, %v282_v19 }
  0x26   :  { %285 = vmatprep.subr.bf16.mxu0 %v331_v5 }
  0x2d   :  { %288 = vmatpush3.bf16.xpose.msk.msra.mxu0 %vm370_vm1, %v286_v23 }
  0x2e   :  { %289 = vmatprep.subr.bf16.mxu0 %v331_v5 }
  0x35   :  { %292 = vmatpush3.bf16.xpose.msk.msra.mxu0 %vm370_vm1, %v290_v26 }
  0x36   :  { %293 = vmatprep.subr.bf16.mxu0 %v331_v5 }
  0x3d   :  { %296 = vmatpush3.bf16.xpose.msk.msra.mxu0 %vm370_vm1, %v294_v29 }
  0x92   :  { %v37_v30 = vpop.xlane.xlu0 %36 }
  0x93   :  { %301 = vrsqrt.f32 %v37_v30  ;;  %v45_v31 = vmax.f32 %v37_v30, 1e-24  ;;  %vm40_vm3 = vcmp.eq.f32.partialorder %v37_v30, inf  ;;  %v43_v34 = vand.u32 2147483648, %v37_v30 }
  0x94   :  { %vm42_vm4 = vcmp.eq.f32.partialorder %v37_v30, 0.0 }
  0x95   :  { %303 = vrsqrt.f32 %v45_v31 }
  0x9d   :  { %v302_v32 = vpop.eup %301 }
  0x9e   :  { %v39_v33 = vmul.f32 %v302_v32, %v37_v30 }
  0x9f   :  { %v304_v35 = vpop.eup %303 }
  0xa0   :  { %v41_v36 = vsel %vm40_vm3, %v37_v30, %v39_v33  ;;  %v47_v38 = vmul.f32 %v304_v35, %v358_v0 }
  0xa1   :  { %v44_v37 = vsel %vm42_vm4, %v43_v34, %v41_v36 }
  0xa2   :  { %v48_v39 = vmul.f32 %v304_v35, %v44_v37  ;;  %263 = vmatmul.mubr.msk.f32.vlgmr.msra.gmra.mrb[0].mxu0 %vm34_vm0, %v47_v38 }
  0xa4   :  { %v176_v41 = vmul.f32 %v212_v40, %v48_v39 }
  0xa6   :  { %v177_v42 = vmax.f32 %v176_v41, 0.0001 }
  0xa8   :  { %305 = vrcp.f32 %v177_v42 }
  0xb2   :  { %v306_v43 = vpop.eup %305 }
 0x175   :  { %v166_v44 = vpop.f32.mrb[0].mxu0 }
 0x176   :  { %v179_v45 = vmul.f32 %v306_v43, %v166_v44  ;;  %v264_v46 = vpop.f32.mrb[1].mxu0 }
 0x178   :  { %180 = vst [vmem:[#allocation2] sm:$0xff] %v179_v45 }
 0x179   :  { %318 = shalt.err (!%p315_p4)
}
 0x17a   :  { %s319_s22 = scalar_lea.hbm %s453_s3, 128 }
 0x17b   :  { %p320_p5 = scmp.ne.s32.totalorder %s453_s3, %s319_s22  ;;  %p323_p6 = scmp.lt.u32.totalorder %s319_s22, %s453_s3 }
 0x17d   :  { %p325_p7 = pnand %p323_p6, %p320_p5 }
 0x17f   :  { %328 = shalt.err (!%p325_p7)
}
 0x180   :  { %190 = dma.vmem_to_hbm [thread:$0]  %s188_s19, 128, %s453_s3, [#allocation3]  }
 0x181   :  { %329 = dma.done.wait [#allocation3], 128  }
 0x182   :  { %330 = vsyncadd [#allocation3], 4294967168 }
 0x183   :  { %194 = vsyncpa [#allocation3], 1 }

</bundles_post_ra>
